<compile_context>
chip_gen: v6e
topology: v6e:2x2x1
jax: 0.10.0
libtpu: 0.0.40
codegen_flags: <defaults>
</compile_context>

<pallas_src>
import jax
import jax.numpy as jnp
from jax.experimental import pallas as pl
from jax.experimental.pallas import tpu as pltpu

OUT_W = 128  # lane-dense output width; the value lives in column 0


def _round_up(x, m):
    return ((x + m - 1) // m) * m


def _choose_bm(batch, cap=2048):
    """Batch tile: multiple of 128, >=2 grid steps when the batch allows (v7x has
    2 TensorCores), capped to amortize per-grid-step overhead."""
    b128 = max(128, _round_up(batch, 128))
    if b128 == 128:
        return 128                      # tiny-batch clamp: single minimal tile
    half = _round_up(b128 // 2, 128)    # aim for >= 2 grid steps
    return min(cap, half)


def _mlp_kernel(x_ref, w1_ref, b1_ref, w2_ref, b2_ref, w3_ref, b3_ref, o_ref):
    # Layer 1: cast activations to bf16 in-kernel (no wrapper pad/cast pass),
    # bf16 MXU matmul with f32 accumulation, f32 bias + ReLU on the VPU.
    x = x_ref[...].astype(jnp.bfloat16)                               # (bm, D)
    h1 = jnp.dot(x, w1_ref[...], preferred_element_type=jnp.float32) + b1_ref[...]
    h1 = jnp.maximum(h1, 0.0)

    # Layer 2: bf16 MXU matmul (256x256, a full MXU pass on v6e/v7x), f32 acc.
    h2 = jnp.dot(h1.astype(jnp.bfloat16), w2_ref[...],
                 preferred_element_type=jnp.float32) + b2_ref[...]
    h2 = jnp.maximum(h2, 0.0)

    # Layer 3 (256 -> 1): MXU matmul against a (256, OUT_W) weight whose column 0
    # is w3 (rest zeros).  Produces a lane-dense (bm, 128) block -> unmasked
    # full-lane stores and a dense writeback DMA; the wrapper takes column 0.
    # The MXU has plenty of slack here, and this keeps the XLU free.
    out = jnp.dot(h2.astype(jnp.bfloat16), w3_ref[...],
                  preferred_element_type=jnp.float32) + b3_ref[...]
    o_ref[...] = out.astype(o_ref.dtype)


def pack_params(params):
    """One-time repack (hoisted out of the forward path): bf16 weights for the MXU,
    defensive 2-D bias shapes, and w3/b3 embedded in column 0 of a 128-wide
    lane-dense final layer."""
    w1, b1, w2, b2, w3, b3 = params
    H = jnp.asarray(w2).shape[0]
    w1p = jnp.asarray(w1, jnp.float32).astype(jnp.bfloat16)            # (D, H)
    w2p = jnp.asarray(w2, jnp.float32).astype(jnp.bfloat16)            # (H, H)
    b1p = jnp.asarray(b1, jnp.float32).reshape(1, H)
    b2p = jnp.asarray(b2, jnp.float32).reshape(1, H)
    w3c = jnp.asarray(w3, jnp.float32).reshape(H, 1)
    b3c = jnp.asarray(b3, jnp.float32).reshape(1, 1)
    w3p = jnp.zeros((H, OUT_W), jnp.float32).at[:, 0:1].set(w3c).astype(jnp.bfloat16)
    b3p = jnp.zeros((1, OUT_W), jnp.float32).at[:, 0:1].set(b3c)
    return (w1p, b1p, w2p, b2p, w3p, b3p)


def value_function_forward(state, packed_params, *, bm=None):
    """state: [B, state_dim] float32; packed_params from pack_params().
    Returns [B, 1] float32."""
    w1p, b1p, w2p, b2p, w3p, b3p = packed_params
    B, D = state.shape

    if bm is None:
        bm = _choose_bm(B)
    Bp = _round_up(B, bm)
    x = state if Bp == B else jnp.pad(state, ((0, Bp - B), (0, 0)))

    grid = (Bp // bm,)
    # Grid-invariant operands: full-array blocks with a constant block index, so
    # Pallas keeps them resident in VMEM instead of re-DMA'ing every step.
    full = lambda shape: pl.BlockSpec(shape, lambda i: (0, 0))

    out = pl.pallas_call(
        _mlp_kernel,
        out_shape=jax.ShapeDtypeStruct((Bp, OUT_W), jnp.float32),
        grid_spec=pltpu.PrefetchScalarGridSpec(
            num_scalar_prefetch=0,
            grid=grid,
            in_specs=[
                pl.BlockSpec((bm, D), lambda i: (i, 0)),   # state tile, unpadded D
                full(w1p.shape), full(b1p.shape),
                full(w2p.shape), full(b2p.shape),
                full(w3p.shape), full(b3p.shape),
            ],
            out_specs=pl.BlockSpec((bm, OUT_W), lambda i: (i, 0)),
        ),
        compiler_params=pltpu.CompilerParams(
            dimension_semantics=("parallel",)),
    )(x, w1p, b1p, w2p, b2p, w3p, b3p)

    return out[:B, 0:1]


def init_value_function_params(key, state_dim, hidden=256):
    """Deterministic synthetic init (PyTorch-Linear-style uniform ranges)."""
    def linear(k, fan_in, fan_out):
        k_w, k_b = jax.random.split(k)
        bound = 1.0 / jnp.sqrt(fan_in)
        w = jax.random.uniform(k_w, (fan_in, fan_out), jnp.float32, -bound, bound)
        b = jax.random.uniform(k_b, (1, fan_out), jnp.float32, -bound, bound)
        return w, b

    k1, k2, k3 = jax.random.split(key, 3)
    w1, b1 = linear(k1, state_dim, hidden)
    w2, b2 = linear(k2, hidden, hidden)
    w3, b3 = linear(k3, hidden, 1)
    return (w1, b1, w2, b2, w3, b3)


def _reference_forward_f32(state, params):
    w1, b1, w2, b2, w3, b3 = params
    h1 = jnp.maximum(state @ w1 + b1.reshape(1, -1), 0.0)
    h2 = jnp.maximum(h1 @ w2 + b2.reshape(1, -1), 0.0)
    return h2 @ w3.reshape(-1, 1) + b3.reshape(1, 1)


def _reference_forward_kernel_numerics(state, params):
    # Mirrors the kernel: bf16 MXU operands with f32 accumulation, f32 bias/ReLU.
    w1, b1, w2, b2, w3, b3 = params
    x = state.astype(jnp.bfloat16)
    h1 = jnp.dot(x, w1.astype(jnp.bfloat16),
                 preferred_element_type=jnp.float32) + b1.reshape(1, -1)
    h1 = jnp.maximum(h1, 0.0)
    h2 = jnp.dot(h1.astype(jnp.bfloat16), w2.astype(jnp.bfloat16),
                 preferred_element_type=jnp.float32) + b2.reshape(1, -1)
    h2 = jnp.maximum(h2, 0.0)
    return jnp.dot(h2.astype(jnp.bfloat16), w3.astype(jnp.bfloat16).reshape(-1, 1),
                   preferred_element_type=jnp.float32) + b3.reshape(1, 1)


if __name__ == "__main__":
    key = jax.random.PRNGKey(0)
    k_params, k_state = jax.random.split(key)

    state_dim = 32
    params = init_value_function_params(k_params, state_dim)
    packed = pack_params(params)   # one-time repack, hoisted out of the forward path

    # Small inference-style batch: clamps to a single minimal 128-row tile.
    batch = 8
    state = jax.random.normal(k_state, (batch, state_dim), jnp.float32)
    out = jax.block_until_ready(value_function_forward(state, packed))
    assert out.shape == (batch, 1)

    # Check vs. a reference that mirrors the kernel's bf16-operand / f32-acc numerics.
    ref_k = _reference_forward_kernel_numerics(state, params)
    assert jnp.allclose(out, ref_k, atol=1e-3, rtol=1e-3)
    # Loose semantic check vs. the pure-f32 PyTorch-equivalent forward.
    ref_f32 = _reference_forward_f32(state, params)
    assert jnp.allclose(out, ref_f32, atol=5e-2, rtol=5e-2)

    # Ragged batch exercising the batch-tail pad and a >=2-step grid.
    batch2 = 300
    state2 = jax.random.normal(jax.random.PRNGKey(1), (batch2, state_dim), jnp.float32)
    out2 = jax.block_until_ready(value_function_forward(state2, packed))
    assert out2.shape == (batch2, 1)
    ref_k2 = _reference_forward_kernel_numerics(state2, params)
    assert jnp.allclose(out2, ref_k2, atol=1e-3, rtol=1e-3)

    print("KERNEL_OK")
</pallas_src>

<mosaic_0001>
module attributes {stable_mosaic.version = 11 : i64} {
  func.func @_mlp_kernel(%arg0: i32, %arg1: memref<128x32xf32, #tpu.memory_space<vmem>>, %arg2: memref<32x256xbf16, #tpu.memory_space<vmem>>, %arg3: memref<1x256xf32, #tpu.memory_space<vmem>>, %arg4: memref<256x256xbf16, #tpu.memory_space<vmem>>, %arg5: memref<1x256xf32, #tpu.memory_space<vmem>>, %arg6: memref<256x128xbf16, #tpu.memory_space<vmem>>, %arg7: memref<1x128xf32, #tpu.memory_space<vmem>>, %arg8: memref<128x128xf32, #tpu.memory_space<vmem>>) attributes {dimension_semantics = [#tpu.dimension_semantics<parallel>], iteration_bounds = array<i64: 1>, scalar_prefetch = 0 : i64, scratch_operands = 0 : i64, tpu.core_type = #tpu.core_type<tc>, window_params = [{transform_indices = @transform_0, window_bounds = array<i64: 128, 32>}, {pipeline_mode = #tpu.pipeline_mode<synchronous>, transform_indices = @transform_1, window_bounds = array<i64: 32, 256>}, {pipeline_mode = #tpu.pipeline_mode<synchronous>, transform_indices = @transform_2, window_bounds = array<i64: 1, 256>}, {pipeline_mode = #tpu.pipeline_mode<synchronous>, transform_indices = @transform_3, window_bounds = array<i64: 256, 256>}, {pipeline_mode = #tpu.pipeline_mode<synchronous>, transform_indices = @transform_4, window_bounds = array<i64: 1, 256>}, {pipeline_mode = #tpu.pipeline_mode<synchronous>, transform_indices = @transform_5, window_bounds = array<i64: 256, 128>}, {pipeline_mode = #tpu.pipeline_mode<synchronous>, transform_indices = @transform_6, window_bounds = array<i64: 1, 128>}, {transform_indices = @transform_7, window_bounds = array<i64: 128, 128>}]} {
    %c0 = arith.constant 0 : index
    %c0_0 = arith.constant 0 : index
    %0 = vector.load %arg1[%c0, %c0_0] : memref<128x32xf32, #tpu.memory_space<vmem>>, vector<128x32xf32>
    %1 = arith.truncf %0 : vector<128x32xf32> to vector<128x32xbf16>
    %c0_1 = arith.constant 0 : index
    %c0_2 = arith.constant 0 : index
    %2 = vector.load %arg2[%c0_1, %c0_2] : memref<32x256xbf16, #tpu.memory_space<vmem>>, vector<32x256xbf16>
    %cst = arith.constant dense<0.000000e+00> : vector<128x256xf32>
    %3 = tpu.matmul %1, %2, %cst {dimension_numbers = #tpu.dot_dimension_numbers<[1], [0], [0], [1], [0, 0, 1, 1], [], []>} : vector<128x32xbf16>, vector<32x256xbf16>, vector<128x256xf32> -> vector<128x256xf32>
    %c0_3 = arith.constant 0 : index
    %c0_4 = arith.constant 0 : index
    %4 = vector.load %arg3[%c0_3, %c0_4] : memref<1x256xf32, #tpu.memory_space<vmem>>, vector<1x256xf32>
    %5 = vector.broadcast %4 : vector<1x256xf32> to vector<128x256xf32>
    %6 = arith.addf %3, %5 : vector<128x256xf32>
    %cst_5 = arith.constant 0.000000e+00 : f32
    %7 = vector.broadcast %cst_5 : f32 to vector<128x256xf32>
    %8 = arith.maximumf %6, %7 : vector<128x256xf32>
    %9 = arith.truncf %8 : vector<128x256xf32> to vector<128x256xbf16>
    %c0_6 = arith.constant 0 : index
    %c0_7 = arith.constant 0 : index
    %10 = vector.load %arg4[%c0_6, %c0_7] : memref<256x256xbf16, #tpu.memory_space<vmem>>, vector<256x256xbf16>
    %cst_8 = arith.constant dense<0.000000e+00> : vector<128x256xf32>
    %11 = tpu.matmul %9, %10, %cst_8 {dimension_numbers = #tpu.dot_dimension_numbers<[1], [0], [0], [1], [0, 0, 1, 1], [], []>} : vector<128x256xbf16>, vector<256x256xbf16>, vector<128x256xf32> -> vector<128x256xf32>
    %c0_9 = arith.constant 0 : index
    %c0_10 = arith.constant 0 : index
    %12 = vector.load %arg5[%c0_9, %c0_10] : memref<1x256xf32, #tpu.memory_space<vmem>>, vector<1x256xf32>
    %13 = vector.broadcast %12 : vector<1x256xf32> to vector<128x256xf32>
    %14 = arith.addf %11, %13 : vector<128x256xf32>
    %cst_11 = arith.constant 0.000000e+00 : f32
    %15 = vector.broadcast %cst_11 : f32 to vector<128x256xf32>
    %16 = arith.maximumf %14, %15 : vector<128x256xf32>
    %17 = arith.truncf %16 : vector<128x256xf32> to vector<128x256xbf16>
    %c0_12 = arith.constant 0 : index
    %c0_13 = arith.constant 0 : index
    %18 = vector.load %arg6[%c0_12, %c0_13] : memref<256x128xbf16, #tpu.memory_space<vmem>>, vector<256x128xbf16>
    %cst_14 = arith.constant dense<0.000000e+00> : vector<128x128xf32>
    %19 = tpu.matmul %17, %18, %cst_14 {dimension_numbers = #tpu.dot_dimension_numbers<[1], [0], [0], [1], [0, 0, 1, 1], [], []>} : vector<128x256xbf16>, vector<256x128xbf16>, vector<128x128xf32> -> vector<128x128xf32>
    %c0_15 = arith.constant 0 : index
    %c0_16 = arith.constant 0 : index
    %20 = vector.load %arg7[%c0_15, %c0_16] : memref<1x128xf32, #tpu.memory_space<vmem>>, vector<1x128xf32>
    %21 = vector.broadcast %20 : vector<1x128xf32> to vector<128x128xf32>
    %22 = arith.addf %19, %21 : vector<128x128xf32>
    %c0_17 = arith.constant 0 : index
    %c0_18 = arith.constant 0 : index
    %23 = vector.load %arg8[%c0_17, %c0_18] : memref<128x128xf32, #tpu.memory_space<vmem>>, vector<128x128xf32>
    tpu.vector_store %arg8[%c0_17, %c0_18], %22 {strides = array<i32>} : memref<128x128xf32, #tpu.memory_space<vmem>>, vector<128x128xf32>,
    return
  }
  func.func @transform_0(%arg0: i32) -> (i32, i32) {
    %c0_i32 = arith.constant 0 : i32
    %c0_i32_0 = arith.constant 0 : i32
    return %arg0, %c0_i32 : i32, i32
  }
  func.func @transform_1(%arg0: i32) -> (i32, i32) {
    %c0_i32 = arith.constant 0 : i32
    %c0_i32_0 = arith.constant 0 : i32
    %c0_i32_1 = arith.constant 0 : i32
    return %c0_i32, %c0_i32_0 : i32, i32
  }
  func.func @transform_2(%arg0: i32) -> (i32, i32) {
    %c0_i32 = arith.constant 0 : i32
    %c0_i32_0 = arith.constant 0 : i32
    %c0_i32_1 = arith.constant 0 : i32
    return %c0_i32, %c0_i32_0 : i32, i32
  }
  func.func @transform_3(%arg0: i32) -> (i32, i32) {
    %c0_i32 = arith.constant 0 : i32
    %c0_i32_0 = arith.constant 0 : i32
    %c0_i32_1 = arith.constant 0 : i32
    return %c0_i32, %c0_i32_0 : i32, i32
  }
  func.func @transform_4(%arg0: i32) -> (i32, i32) {
    %c0_i32 = arith.constant 0 : i32
    %c0_i32_0 = arith.constant 0 : i32
    %c0_i32_1 = arith.constant 0 : i32
    return %c0_i32, %c0_i32_0 : i32, i32
  }
  func.func @transform_5(%arg0: i32) -> (i32, i32) {
    %c0_i32 = arith.constant 0 : i32
    %c0_i32_0 = arith.constant 0 : i32
    %c0_i32_1 = arith.constant 0 : i32
    return %c0_i32, %c0_i32_0 : i32, i32
  }
  func.func @transform_6(%arg0: i32) -> (i32, i32) {
    %c0_i32 = arith.constant 0 : i32
    %c0_i32_0 = arith.constant 0 : i32
    %c0_i32_1 = arith.constant 0 : i32
    return %c0_i32, %c0_i32_0 : i32, i32
  }
  func.func @transform_7(%arg0: i32) -> (i32, i32) {
    %c0_i32 = arith.constant 0 : i32
    %c0_i32_0 = arith.constant 0 : i32
    return %arg0, %c0_i32 : i32, i32
  }
}

</mosaic_0001>

<bundles_post_ra>
// kernel: tpu_custom_call.1
= control target key start
LH: loop header
LB: loop body
LE: loop exit
PB: predicated region body
PF: predicated region fallthrough
CT: control target
= control target key end

     0   :  { %12 = vsyncpa [#allocation3], 0  ;;  %s1454_s0 = inlined_call_operand.vmem [shape: f32[128,32], index: 0, kind: input, shape index: {}]   ;;  %s1455_s1 = inlined_call_operand.vmem [shape: bf16[32,256], index: 1, kind: input, shape index: {}]   ;;  %s1456_s2 = inlined_call_operand.vmem [shape: f32[1,256], index: 2, kind: input, shape index: {}]   ;;  %s1457_s3 = inlined_call_operand.hbm [shape: bf16[256,256], index: 3, kind: input, shape index: {}]   ;;  %s1458_s4 = inlined_call_operand.vmem [shape: f32[1,256], index: 4, kind: input, shape index: {}]   ;;  %s1459_s5 = inlined_call_operand.vmem [shape: bf16[256,128], index: 5, kind: input, shape index: {}]   ;;  %s1460_s6 = inlined_call_operand.vmem [shape: f32[1,128], index: 6, kind: input, shape index: {}]   ;;  %s1461_s7 = inlined_call_operand.hbm [shape: f32[128,128], index: 7, kind: output, shape index: {}]  }
   0x1   :  { %13 = vsyncpa [#allocation4], 0  ;;  %s1162_s24 = smov [#allocation2]  }
   0x2   :  { %s25_s25 = sshll.u32 %s1162_s24, 4  ;;  %s26_s25 = int_to_ptr.vmem [resolvable:$true] %s25_s25 }
   0x3   :  { %s1126_s26 = scalar_lea.vmem %s26_s25, 4096  ;;  %p1131_p1 = scmp.lt.s32.totalorder %s26_s25, %s26_s25 }
   0x4   :  { %p1127_p0 = scmp.ne.s32.totalorder %s26_s25, %s1126_s26  ;;  %p1132_p2 = scmp.lt.s32.totalorder %s1126_s26, %s1126_s26 }
   0x6   :  { %p1133_p3 = por %p1132_p2, %p1131_p1 }
   0x8   :  { %p1134_p4 = pnand %p1133_p3, %p1127_p0 }
   0xa   :  { %1137 = shalt.err (!%p1134_p4)
}
   0xb   :  { %s1163_s27 = smov 128   ;;  %s1164_s28 = smov 8  }
   0xc   :  { %31 = dma.hbm_to_vmem [thread:$0]  %s1457_s3, 4096, %s26_s25, [#allocation3], %s1163_s27, %s1163_s27, %s1164_s28  }
   0xd   :  { %1158 = dma.done.wait [#allocation3], 4096  }
   0xe   :  { %1159 = vsyncadd [#allocation3], 4294963200  ;;  %v1165_v0 = vmov 0   ;;  %v1048_v1 = vld [vmem:[%s1455_s1 + $0x14] ss:$8 sps:$4 sm:$0xff]   ;;  %v42_v5 = vld [vmem:[%s1454_s0] sm:$0xff] }
   0xf   :  { %159 = vmatprep.mubr.bf16.mxu0 %v1165_v0  ;;  %v1050_v2 = vld [vmem:[%s1455_s1 + $0x10] ss:$8 sps:$4 sm:$0xff]   ;;  %139 = vmatprep.subr.bf16.mxu0 %v1048_v1  ;;  %v1051_v3 = vld [vmem:[%s1455_s1 + $0x4] ss:$8 sps:$4 sm:$0xff]   ;;  %v1053_v4 = vld [vmem:[%s1455_s1] ss:$8 sps:$4 sm:$0xff]  }
  0x10   :  { %140 = vmatpush1.bf16.msra.mxu0 %v1050_v2  ;;  %v43_v6 = vld [vmem:[%s1454_s0 + $0x8] sm:$0xff]  ;;  %vm102_vm0 = vcmask 261120   ;;  %v1054_v8 = vld [vmem:[#allocation2 + $0x74] ss:$8 sps:$4 sm:$0xff]   ;;  %v1056_v9 = vld [vmem:[#allocation2 + $0x70] ss:$8 sps:$4 sm:$0xff]  }
  0x11   :  { %141 = vmatprep.subr.bf16.mxu0 %v1051_v3  ;;  %v58_v7 = vpack.c.bf16 %v43_v6, %v42_v5  ;;  %v44_v10 = vld [vmem:[%s1454_s0 + $0x10] sm:$0xff]  ;;  %492 = vmatprep.subr.bf16.mxu1 %v1054_v8  ;;  %v1057_v11 = vld [vmem:[#allocation2 + $0x64] ss:$8 sps:$4 sm:$0xff]   ;;  %v45_v12 = vld [vmem:[%s1454_s0 + $0x18] sm:$0xff] }
  0x12   :  { %493 = vmatpush1.bf16.msra.mxu1 %v1056_v9  ;;  %v1059_v13 = vld [vmem:[#allocation2 + $0x60] ss:$8 sps:$4 sm:$0xff]   ;;  %v1060_v14 = vld [vmem:[#allocation2 + $0x54] ss:$8 sps:$4 sm:$0xff]   ;;  %v59_v15 = vpack.c.bf16 %v45_v12, %v44_v10  ;;  %v1062_v16 = vld [vmem:[#allocation2 + $0x50] ss:$8 sps:$4 sm:$0xff]  }
  0x13   :  { %494 = vmatprep.subr.bf16.mxu1 %v1057_v11  ;;  %v1063_v17 = vld [vmem:[#allocation2 + $0x44] ss:$8 sps:$4 sm:$0xff]   ;;  %v1065_v20 = vld [vmem:[#allocation2 + $0x40] ss:$8 sps:$4 sm:$0xff]   ;;  %v1066_v21 = vld [vmem:[#allocation2 + $0x34] ss:$8 sps:$4 sm:$0xff]   ;;  %v72_v11 = vlaneseq }
  0x14   :  { %142 = vmatpush1.bf16.msra.mxu0 %v1053_v4  ;;  %v46_v18 = vld [vmem:[%s1454_s0 + $0x20] sm:$0xff]  ;;  %v47_v19 = vld [vmem:[%s1454_s0 + $0x28] sm:$0xff]  ;;  %v1068_v23 = vld [vmem:[#allocation2 + $0x30] ss:$8 sps:$4 sm:$0xff]  }
  0x15   :  { %v60_v22 = vpack.c.bf16 %v47_v19, %v46_v18  ;;  %v1069_v24 = vld [vmem:[#allocation2 + $0x24] ss:$8 sps:$4 sm:$0xff]   ;;  %v48_v25 = vld [vmem:[%s1454_s0 + $0x30] sm:$0xff]  ;;  %v49_v26 = vld [vmem:[%s1454_s0 + $0x38] sm:$0xff]  ;;  %v1331_v12 = vshrl.u32 %v72_v11, 7 }
  0x16   :  { %495 = vmatpush1.bf16.msra.mxu1 %v1059_v13  ;;  %v1071_v27 = vld [vmem:[#allocation2 + $0x20] ss:$8 sps:$4 sm:$0xff]   ;;  %v1072_v28 = vld [vmem:[#allocation2 + $0x14] ss:$8 sps:$4 sm:$0xff]   ;;  %v1074_v29 = vld [vmem:[#allocation2 + $0x10] ss:$8 sps:$4 sm:$0xff]   ;;  %v61_v30 = vpack.c.bf16 %v49_v26, %v48_v25 }
  0x17   :  { %922 = vmatmul.mubr.msk.bf16.vlgmr.msra.gmra.mxu0 %vm102_vm0, %v58_v7  ;;  %496 = vmatprep.subr.bf16.mxu1 %v1060_v14  ;;  %v1075_v31 = vld [vmem:[#allocation2 + $0x4] ss:$8 sps:$4 sm:$0xff]   ;;  %v1077_v34 = vld [vmem:[#allocation2] ss:$8 sps:$4 sm:$0xff]   ;;  %v1078_v35 = vld [vmem:[#allocation2 + $0xf4] ss:$8 sps:$4 sm:$0xff]  }
  0x18   :  { %169 = vmatprep.mubr.bf16.mxu0 %v1165_v0  ;;  %v50_v32 = vld [vmem:[%s1454_s0 + $0x40] sm:$0xff]  ;;  %v51_v33 = vld [vmem:[%s1454_s0 + $0x48] sm:$0xff]  ;;  %v1080_v37 = vld [vmem:[#allocation2 + $0xf0] ss:$8 sps:$4 sm:$0xff]   ;;  %v78_v13 = vsub.s32 1, %v1331_v12  ;;  %v74_v14 = vsub.s32 0, %v1331_v12 }
  0x19   :  { %v62_v36 = vpack.c.bf16 %v51_v33, %v50_v32  ;;  %v1081_v38 = vld [vmem:[#allocation2 + $0xe4] ss:$8 sps:$4 sm:$0xff]   ;;  %v52_v39 = vld [vmem:[%s1454_s0 + $0x50] sm:$0xff]  ;;  %v53_v40 = vld [vmem:[%s1454_s0 + $0x58] sm:$0xff] }
  0x1a   :  { %497 = vmatpush1.bf16.msra.mxu1 %v1062_v16  ;;  %v1083_v41 = vld [vmem:[#allocation2 + $0xe0] ss:$8 sps:$4 sm:$0xff]   ;;  %v1084_v42 = vld [vmem:[#allocation2 + $0xd4] ss:$8 sps:$4 sm:$0xff]   ;;  %v63_v43 = vpack.c.bf16 %v53_v40, %v52_v39  ;;  %v1086_v44 = vld [vmem:[#allocation2 + $0xd0] ss:$8 sps:$4 sm:$0xff]  }
  0x1b   :  { %498 = vmatprep.subr.bf16.mxu1 %v1063_v17  ;;  %v1087_v45 = vld [vmem:[#allocation2 + $0xc4] ss:$8 sps:$4 sm:$0xff]   ;;  %v1089_v48 = vld [vmem:[#allocation2 + $0xc0] ss:$8 sps:$4 sm:$0xff]   ;;  %v1090_v49 = vld [vmem:[#allocation2 + $0xb4] ss:$8 sps:$4 sm:$0xff]  }
  0x1c   :  { %v54_v46 = vld [vmem:[%s1454_s0 + $0x60] sm:$0xff]  ;;  %v55_v47 = vld [vmem:[%s1454_s0 + $0x68] sm:$0xff]  ;;  %v1092_v51 = vld [vmem:[#allocation2 + $0xb0] ss:$8 sps:$4 sm:$0xff]  }
  0x1d   :  { %v64_v50 = vpack.c.bf16 %v55_v47, %v54_v46  ;;  %v56_v52 = vld [vmem:[%s1454_s0 + $0x70] sm:$0xff]  ;;  %v57_v53 = vld [vmem:[%s1454_s0 + $0x78] sm:$0xff]  ;;  %v1093_v55 = vld [vmem:[#allocation2 + $0xa4] ss:$8 sps:$4 sm:$0xff]  }
  0x1e   :  { %499 = vmatpush1.bf16.msra.mxu1 %v1065_v20  ;;  %v65_v54 = vpack.c.bf16 %v57_v53, %v56_v52  ;;  %v1095_v56 = vld [vmem:[#allocation2 + $0xa0] ss:$8 sps:$4 sm:$0xff]   ;;  %v1096_v57 = vld [vmem:[#allocation2 + $0x94] ss:$8 sps:$4 sm:$0xff]   ;;  %v1098_v58 = vld [vmem:[#allocation2 + $0x90] ss:$8 sps:$4 sm:$0xff]  }
  0x1f   :  { %923 = vmatmul.mubr.msk.bf16.gmra.mxu0 %vm102_vm0, %v59_v15  ;;  %500 = vmatprep.subr.bf16.mxu1 %v1066_v21  ;;  %v1099_v59 = vld [vmem:[#allocation2 + $0x84] ss:$8 sps:$4 sm:$0xff]   ;;  %v1101_v60 = vld [vmem:[#allocation2 + $0x80] ss:$8 sps:$4 sm:$0xff]   ;;  %v1102_v61 = vld [vmem:[%s1459_s5 + $0x78] sm:$0xff]  }
  0x20   :  { %179 = vmatprep.mubr.bf16.mxu0 %v1165_v0  ;;  %v1103_v62 = vld [vmem:[%s1459_s5 + $0x38] sm:$0xff]   ;;  %v1104_v63 = vld [vmem:[%s1459_s5 + $0x70] sm:$0xff]   ;;  %979 = vmatprep.subr.bf16.mxu0 %v1102_v61  ;;  %v1106_v1 = vld [vmem:[%s1459_s5 + $0x68] sm:$0xff]  }
  0x21   :  { %980 = vmatpush3.bf16.msra.mxu0 %v1103_v62  ;;  %v1107_v2 = vld [vmem:[%s1459_s5 + $0x28] sm:$0xff]   ;;  %v1108_v3 = vld [vmem:[%s1459_s5 + $0x60] sm:$0xff]   ;;  %v1110_v5 = vld [vmem:[%s1459_s5 + $0x58] sm:$0xff]  }
  0x22   :  { %501 = vmatpush1.bf16.msra.mxu1 %v1068_v23  ;;  %981 = vmatprep.subr.bf16.mxu0 %v1104_v63  ;;  %v1109_v4 = vld [vmem:[%s1459_s5 + $0x20] sm:$0xff]   ;;  %v1111_v6 = vld [vmem:[%s1459_s5 + $0x18] sm:$0xff]   ;;  %v1112_v7 = vld [vmem:[%s1459_s5 + $0x50] sm:$0xff]  }
  0x23   :  { %502 = vmatprep.subr.bf16.mxu1 %v1069_v24  ;;  %v1113_v8 = vld [vmem:[%s1459_s5 + $0x10] sm:$0xff]   ;;  %v1114_v9 = vld [vmem:[%s1459_s5 + $0x48] sm:$0xff]   ;;  %v70_v15 = vld [vmem:[%s1456_s2] sm:$0x3] }
  0x24   :  { %v1115_v10 = vld [vmem:[%s1459_s5 + $0x8] sm:$0xff]   ;;  %v1340_v17 = vrot.slane %v70_v15, %v78_v13  ;;  %v1344_v18 = vrot.slane %v70_v15, %v74_v14 }
  0x26   :  { %503 = vmatpush1.bf16.msra.mxu1 %v1071_v27 }
  0x27   :  { %924 = vmatmul.mubr.msk.bf16.gmra.mxu0 %vm102_vm0, %v60_v22  ;;  %504 = vmatprep.subr.bf16.mxu1 %v1072_v28 }
  0x28   :  { %189 = vmatprep.mubr.bf16.mxu0 %v1165_v0 }
  0x2a   :  { %505 = vmatpush1.bf16.msra.mxu1 %v1074_v29 }
  0x2b   :  { %506 = vmatprep.subr.bf16.mxu1 %v1075_v31 }
  0x2e   :  { %507 = vmatpush1.bf16.msra.mxu1 %v1077_v34 }
  0x2f   :  { %925 = vmatmul.mubr.msk.bf16.gmra.mxu0 %vm102_vm0, %v61_v30  ;;  %508 = vmatprep.subr.bf16.mxu1 %v1078_v35 }
  0x30   :  { %199 = vmatprep.mubr.bf16.mxu0 %v1165_v0 }
  0x32   :  { %509 = vmatpush2.bf16.msra.mxu1 %v1080_v37 }
  0x33   :  { %510 = vmatprep.subr.bf16.mxu1 %v1081_v38 }
  0x36   :  { %511 = vmatpush2.bf16.msra.mxu1 %v1083_v41 }
  0x37   :  { %926 = vmatmul.mubr.msk.bf16.gmra.mxu0 %vm102_vm0, %v62_v36  ;;  %512 = vmatprep.subr.bf16.mxu1 %v1084_v42 }
  0x38   :  { %209 = vmatprep.mubr.bf16.mxu0 %v1165_v0 }
  0x3a   :  { %513 = vmatpush2.bf16.msra.mxu1 %v1086_v44 }
  0x3b   :  { %514 = vmatprep.subr.bf16.mxu1 %v1087_v45 }
  0x3e   :  { %515 = vmatpush2.bf16.msra.mxu1 %v1089_v48 }
  0x3f   :  { %927 = vmatmul.mubr.msk.bf16.gmra.mxu0 %vm102_vm0, %v63_v43  ;;  %516 = vmatprep.subr.bf16.mxu1 %v1090_v49 }
  0x40   :  { %219 = vmatprep.mubr.bf16.mxu0 %v1165_v0 }
  0x42   :  { %517 = vmatpush2.bf16.msra.mxu1 %v1092_v51 }
  0x43   :  { %518 = vmatprep.subr.bf16.mxu1 %v1093_v55 }
  0x46   :  { %519 = vmatpush2.bf16.msra.mxu1 %v1095_v56 }
  0x47   :  { %928 = vmatmul.mubr.msk.bf16.gmra.mxu0 %vm102_vm0, %v64_v50  ;;  %520 = vmatprep.subr.bf16.mxu1 %v1096_v57 }
  0x48   :  { %229 = vmatprep.mubr.bf16.mxu0 %v1165_v0  ;;  %v1105_v0 = vld [vmem:[%s1459_s5 + $0x30] sm:$0xff]  }
  0x49   :  { %982 = vmatpush3.bf16.msra.mxu0 %v1105_v0 }
  0x4a   :  { %521 = vmatpush2.bf16.msra.mxu1 %v1098_v58  ;;  %983 = vmatprep.subr.bf16.mxu0 %v1106_v1 }
  0x4b   :  { %522 = vmatprep.subr.bf16.mxu1 %v1099_v59 }
  0x4d   :  { %984 = vmatpush3.bf16.msra.mxu0 %v1107_v2 }
  0x4e   :  { %523 = vmatpush2.bf16.msra.mxu1 %v1101_v60  ;;  %985 = vmatprep.subr.bf16.mxu0 %v1108_v3 }
  0x4f   :  { %929 = vmatmul.mubr.msk.bf16.gmra.mxu0 %vm102_vm0, %v65_v54 }
  0x51   :  { %986 = vmatpush3.bf16.msra.mxu0 %v1109_v4 }
  0x52   :  { %987 = vmatprep.subr.bf16.mxu0 %v1110_v5 }
  0x55   :  { %988 = vmatpush3.bf16.msra.mxu0 %v1111_v6 }
  0x56   :  { %989 = vmatprep.subr.bf16.mxu0 %v1112_v7 }
  0x59   :  { %990 = vmatpush3.bf16.msra.mxu0 %v1113_v8 }
  0x5a   :  { %991 = vmatprep.subr.bf16.mxu0 %v1114_v9 }
  0x5d   :  { %992 = vmatpush3.bf16.msra.mxu0 %v1115_v10 }
  0xd7   :  { %v161_v16 = vpop.f32.mrf.mxu0 }
  0xd8   :  { %v162_v23 = vadd.f32 %v161_v16, %v1344_v18 }
  0xd9   :  { %v163_v19 = vpop.f32.mrf.mxu0 }
  0xda   :  { %v164_v21 = vadd.f32 %v163_v19, %v1340_v17  ;;  %v240_v30 = vmax.f32 %v162_v23, 0.0 }
  0xdb   :  { %v165_v20 = vpop.f32.mrf.mxu0 }
  0xdc   :  { %v166_v22 = vadd.f32 %v165_v20, %v1344_v18  ;;  %v241_v28 = vmax.f32 %v164_v21, 0.0 }
  0xdd   :  { %v167_v24 = vpop.f32.mrf.mxu0 }
  0xde   :  { %v168_v25 = vadd.f32 %v167_v24, %v1340_v17  ;;  %v242_v26 = vmax.f32 %v166_v22, 0.0 }
  0xdf   :  { %v171_v27 = vpop.f32.mrf.mxu0 }
  0xe0   :  { %v243_v29 = vmax.f32 %v168_v25, 0.0  ;;  %v272_v33 = vpack.c.bf16 %v242_v26, %v240_v30  ;;  %v172_v37 = vadd.f32 %v171_v27, %v1344_v18 }
  0xe1   :  { %v173_v31 = vpop.f32.mrf.mxu0 }
  0xe2   :  { %v273_v32 = vpack.c.bf16 %v243_v29, %v241_v28  ;;  %v174_v35 = vadd.f32 %v173_v31, %v1340_v17  ;;  %v244_v44 = vmax.f32 %v172_v37, 0.0 }
  0xe3   :  { %v175_v34 = vpop.f32.mrf.mxu0 }
  0xe4   :  { %v176_v36 = vadd.f32 %v175_v34, %v1344_v18  ;;  %524 = vmatprep.mubr.bf16.mxu1 %v273_v32  ;;  %v245_v42 = vmax.f32 %v174_v35, 0.0 }
  0xe5   :  { %v177_v38 = vpop.f32.mrf.mxu0  ;;  %525 = vmatmul.mubr.bf16.vlgmr.msra.gmra.mxu1 %v272_v33 }
  0xe6   :  { %v178_v39 = vadd.f32 %v177_v38, %v1340_v17  ;;  %v246_v40 = vmax.f32 %v176_v36, 0.0 }
  0xe7   :  { %v181_v41 = vpop.f32.mrf.mxu0 }
  0xe8   :  { %v247_v43 = vmax.f32 %v178_v39, 0.0  ;;  %v274_v47 = vpack.c.bf16 %v246_v40, %v244_v44  ;;  %v182_v51 = vadd.f32 %v181_v41, %v1344_v18 }
  0xe9   :  { %v183_v45 = vpop.f32.mrf.mxu0 }
  0xea   :  { %v275_v46 = vpack.c.bf16 %v247_v43, %v245_v42  ;;  %v184_v49 = vadd.f32 %v183_v45, %v1340_v17  ;;  %v248_v58 = vmax.f32 %v182_v51, 0.0 }
  0xeb   :  { %v185_v48 = vpop.f32.mrf.mxu0 }
  0xec   :  { %v186_v50 = vadd.f32 %v185_v48, %v1344_v18  ;;  %534 = vmatprep.mubr.bf16.mxu1 %v275_v46  ;;  %v249_v56 = vmax.f32 %v184_v49, 0.0 }
  0xed   :  { %v187_v52 = vpop.f32.mrf.mxu0  ;;  %535 = vmatmul.mubr.bf16.gmra.mxu1 %v274_v47 }
  0xee   :  { %v188_v53 = vadd.f32 %v187_v52, %v1340_v17  ;;  %v250_v54 = vmax.f32 %v186_v50, 0.0 }
  0xef   :  { %v191_v55 = vpop.f32.mrf.mxu0 }
  0xf0   :  { %v251_v57 = vmax.f32 %v188_v53, 0.0  ;;  %v276_v61 = vpack.c.bf16 %v250_v54, %v248_v58  ;;  %v192_v1 = vadd.f32 %v191_v55, %v1344_v18 }
  0xf1   :  { %v193_v59 = vpop.f32.mrf.mxu0 }
  0xf2   :  { %v277_v60 = vpack.c.bf16 %v251_v57, %v249_v56  ;;  %v194_v63 = vadd.f32 %v193_v59, %v1340_v17  ;;  %v252_v8 = vmax.f32 %v192_v1, 0.0 }
  0xf3   :  { %v195_v62 = vpop.f32.mrf.mxu0 }
  0xf4   :  { %v196_v0 = vadd.f32 %v195_v62, %v1344_v18  ;;  %544 = vmatprep.mubr.bf16.mxu1 %v277_v60  ;;  %v253_v6 = vmax.f32 %v194_v63, 0.0 }
  0xf5   :  { %v197_v2 = vpop.f32.mrf.mxu0  ;;  %545 = vmatmul.mubr.bf16.gmra.mxu1 %v276_v61 }
  0xf6   :  { %v198_v3 = vadd.f32 %v197_v2, %v1340_v17  ;;  %v254_v4 = vmax.f32 %v196_v0, 0.0 }
  0xf7   :  { %v201_v5 = vpop.f32.mrf.mxu0 }
  0xf8   :  { %v255_v7 = vmax.f32 %v198_v3, 0.0  ;;  %v278_v11 = vpack.c.bf16 %v254_v4, %v252_v8  ;;  %v202_v20 = vadd.f32 %v201_v5, %v1344_v18 }
  0xf9   :  { %v203_v9 = vpop.f32.mrf.mxu0 }
  0xfa   :  { %v279_v10 = vpack.c.bf16 %v255_v7, %v253_v6  ;;  %v204_v16 = vadd.f32 %v203_v9, %v1340_v17  ;;  %v256_v27 = vmax.f32 %v202_v20, 0.0  ;;  %v1116_v7 = vld [vmem:[%s1459_s5 + $0x40] sm:$0xff]  }
  0xfb   :  { %v205_v15 = vpop.f32.mrf.mxu0  ;;  %993 = vmatprep.subr.bf16.mxu0 %v1116_v7 }
  0xfc   :  { %v206_v19 = vadd.f32 %v205_v15, %v1344_v18  ;;  %554 = vmatprep.mubr.bf16.mxu1 %v279_v10  ;;  %v257_v25 = vmax.f32 %v204_v16, 0.0 }
  0xfd   :  { %v207_v21 = vpop.f32.mrf.mxu0  ;;  %555 = vmatmul.mubr.bf16.gmra.mxu1 %v278_v11 }
  0xfe   :  { %v208_v22 = vadd.f32 %v207_v21, %v1340_v17  ;;  %v258_v23 = vmax.f32 %v206_v19, 0.0 }
  0xff   :  { %v211_v24 = vpop.f32.mrf.mxu0 }
 0x100   :  { %v259_v26 = vmax.f32 %v208_v22, 0.0  ;;  %v280_v30 = vpack.c.bf16 %v258_v23, %v256_v27  ;;  %v212_v34 = vadd.f32 %v211_v24, %v1344_v18 }
 0x101   :  { %v213_v28 = vpop.f32.mrf.mxu0 }
 0x102   :  { %v281_v29 = vpack.c.bf16 %v259_v26, %v257_v25  ;;  %v214_v32 = vadd.f32 %v213_v28, %v1340_v17  ;;  %v260_v41 = vmax.f32 %v212_v34, 0.0 }
 0x103   :  { %v215_v31 = vpop.f32.mrf.mxu0 }
 0x104   :  { %v216_v33 = vadd.f32 %v215_v31, %v1344_v18  ;;  %564 = vmatprep.mubr.bf16.mxu1 %v281_v29  ;;  %v261_v39 = vmax.f32 %v214_v32, 0.0 }
 0x105   :  { %v217_v35 = vpop.f32.mrf.mxu0  ;;  %565 = vmatmul.mubr.bf16.gmra.mxu1 %v280_v30 }
 0x106   :  { %v218_v36 = vadd.f32 %v217_v35, %v1340_v17  ;;  %v262_v37 = vmax.f32 %v216_v33, 0.0 }
 0x107   :  { %v221_v38 = vpop.f32.mrf.mxu0 }
 0x108   :  { %v263_v40 = vmax.f32 %v218_v36, 0.0  ;;  %v282_v44 = vpack.c.bf16 %v262_v37, %v260_v41  ;;  %v222_v48 = vadd.f32 %v221_v38, %v1344_v18 }
 0x109   :  { %v223_v42 = vpop.f32.mrf.mxu0 }
 0x10a   :  { %v283_v43 = vpack.c.bf16 %v263_v40, %v261_v39  ;;  %v224_v46 = vadd.f32 %v223_v42, %v1340_v17  ;;  %v264_v55 = vmax.f32 %v222_v48, 0.0 }
 0x10b   :  { %v225_v45 = vpop.f32.mrf.mxu0 }
 0x10c   :  { %v226_v47 = vadd.f32 %v225_v45, %v1344_v18  ;;  %574 = vmatprep.mubr.bf16.mxu1 %v283_v43  ;;  %v265_v53 = vmax.f32 %v224_v46, 0.0 }
 0x10d   :  { %v227_v49 = vpop.f32.mrf.mxu0  ;;  %575 = vmatmul.mubr.bf16.gmra.mxu1 %v282_v44 }
 0x10e   :  { %v228_v50 = vadd.f32 %v227_v49, %v1340_v17  ;;  %v266_v51 = vmax.f32 %v226_v47, 0.0 }
 0x10f   :  { %v231_v52 = vpop.f32.mrf.mxu0 }
 0x110   :  { %v267_v54 = vmax.f32 %v228_v50, 0.0  ;;  %v284_v58 = vpack.c.bf16 %v266_v51, %v264_v55  ;;  %v232_v62 = vadd.f32 %v231_v52, %v1344_v18 }
 0x111   :  { %v233_v56 = vpop.f32.mrf.mxu0 }
 0x112   :  { %v285_v57 = vpack.c.bf16 %v267_v54, %v265_v53  ;;  %v234_v60 = vadd.f32 %v233_v56, %v1340_v17  ;;  %v268_v4 = vmax.f32 %v232_v62, 0.0 }
 0x113   :  { %v235_v59 = vpop.f32.mrf.mxu0 }
 0x114   :  { %v236_v61 = vadd.f32 %v235_v59, %v1344_v18  ;;  %584 = vmatprep.mubr.bf16.mxu1 %v285_v57  ;;  %v269_v2 = vmax.f32 %v234_v60, 0.0  ;;  %v1117_v18 = vld [vmem:[%s1459_s5] sm:$0xff]  }
 0x115   :  { %v237_v63 = vpop.f32.mrf.mxu0  ;;  %585 = vmatmul.mubr.bf16.gmra.mxu1 %v284_v58  ;;  %994 = vmatpush3.bf16.msra.mxu0 %v1117_v18 }
 0x116   :  { %v238_v0 = vadd.f32 %v237_v63, %v1340_v17  ;;  %v270_v1 = vmax.f32 %v236_v61, 0.0  ;;  %v320_v17 = vld [vmem:[%s1458_s4] sm:$0x3] }
 0x117   :  { %v1389_v9 = vrot.slane %v320_v17, %v78_v13  ;;  %v1393_v10 = vrot.slane %v320_v17, %v74_v14 }
 0x118   :  { %v271_v3 = vmax.f32 %v238_v0, 0.0  ;;  %v286_v6 = vpack.c.bf16 %v270_v1, %v268_v4 }
 0x11a   :  { %v287_v5 = vpack.c.bf16 %v271_v3, %v269_v2 }
 0x11c   :  { %594 = vmatprep.mubr.bf16.mxu1 %v287_v5 }
 0x11d   :  { %595 = vmatmul.mubr.bf16.gmra.mxu1 %v286_v6 }
 0x1a5   :  { %v526_v8 = vpop.f32.mrf.mxu1 }
 0x1a6   :  { %v527_v20 = vadd.f32 %v526_v8, %v1393_v10 }
 0x1a7   :  { %v528_v11 = vpop.f32.mrf.mxu1 }
 0x1a8   :  { %v529_v16 = vadd.f32 %v528_v11, %v1389_v9  ;;  %v605_v26 = vmax.f32 %v527_v20, 0.0 }
 0x1a9   :  { %v530_v15 = vpop.f32.mrf.mxu1 }
 0x1aa   :  { %v531_v19 = vadd.f32 %v530_v15, %v1393_v10  ;;  %v606_v25 = vmax.f32 %v529_v16, 0.0 }
 0x1ab   :  { %v532_v21 = vpop.f32.mrf.mxu1 }
 0x1ac   :  { %v533_v22 = vadd.f32 %v532_v21, %v1389_v9  ;;  %v607_v23 = vmax.f32 %v531_v19, 0.0 }
 0x1ad   :  { %v536_v24 = vpop.f32.mrf.mxu1 }
 0x1ae   :  { %v608_v13 = vmax.f32 %v533_v22, 0.0  ;;  %v637_v14 = vpack.c.bf16 %v607_v23, %v605_v26  ;;  %v537_v31 = vadd.f32 %v536_v24, %v1393_v10 }
 0x1af   :  { %v538_v27 = vpop.f32.mrf.mxu1 }
 0x1b0   :  { %v638_v12 = vpack.c.bf16 %v608_v13, %v606_v25  ;;  %v539_v29 = vadd.f32 %v538_v27, %v1389_v9  ;;  %v609_v38 = vmax.f32 %v537_v31, 0.0 }
 0x1b1   :  { %v540_v28 = vpop.f32.mrf.mxu1 }
 0x1b2   :  { %v541_v30 = vadd.f32 %v540_v28, %v1393_v10  ;;  %820 = vmatprep.mubr.bf16.mxu0 %v638_v12  ;;  %v610_v36 = vmax.f32 %v539_v29, 0.0 }
 0x1b3   :  { %v542_v32 = vpop.f32.mrf.mxu1  ;;  %821 = vmatmul.mubr.bf16.vlgmr.msra.gmra.mxu0 %v637_v14 }
 0x1b4   :  { %v543_v33 = vadd.f32 %v542_v32, %v1389_v9  ;;  %v611_v34 = vmax.f32 %v541_v30, 0.0 }
 0x1b5   :  { %v546_v35 = vpop.f32.mrf.mxu1 }
 0x1b6   :  { %v612_v37 = vmax.f32 %v543_v33, 0.0  ;;  %v639_v41 = vpack.c.bf16 %v611_v34, %v609_v38  ;;  %v547_v45 = vadd.f32 %v546_v35, %v1393_v10 }
 0x1b7   :  { %v548_v39 = vpop.f32.mrf.mxu1 }
 0x1b8   :  { %v640_v40 = vpack.c.bf16 %v612_v37, %v610_v36  ;;  %v549_v43 = vadd.f32 %v548_v39, %v1389_v9  ;;  %v613_v52 = vmax.f32 %v547_v45, 0.0 }
 0x1b9   :  { %v550_v42 = vpop.f32.mrf.mxu1 }
 0x1ba   :  { %v551_v44 = vadd.f32 %v550_v42, %v1393_v10  ;;  %828 = vmatprep.mubr.bf16.mxu0 %v640_v40  ;;  %v614_v50 = vmax.f32 %v549_v43, 0.0 }
 0x1bb   :  { %v552_v46 = vpop.f32.mrf.mxu1  ;;  %829 = vmatmul.mubr.bf16.gmra.mxu0 %v639_v41 }
 0x1bc   :  { %v553_v47 = vadd.f32 %v552_v46, %v1389_v9  ;;  %v615_v48 = vmax.f32 %v551_v44, 0.0 }
 0x1bd   :  { %v556_v49 = vpop.f32.mrf.mxu1 }
 0x1be   :  { %v616_v51 = vmax.f32 %v553_v47, 0.0  ;;  %v641_v55 = vpack.c.bf16 %v615_v48, %v613_v52  ;;  %v557_v59 = vadd.f32 %v556_v49, %v1393_v10 }
 0x1bf   :  { %v558_v53 = vpop.f32.mrf.mxu1 }
 0x1c0   :  { %v642_v54 = vpack.c.bf16 %v616_v51, %v614_v50  ;;  %v559_v57 = vadd.f32 %v558_v53, %v1389_v9  ;;  %v617_v2 = vmax.f32 %v557_v59, 0.0 }
 0x1c1   :  { %v560_v56 = vpop.f32.mrf.mxu1 }
 0x1c2   :  { %v561_v58 = vadd.f32 %v560_v56, %v1393_v10  ;;  %836 = vmatprep.mubr.bf16.mxu0 %v642_v54  ;;  %v618_v0 = vmax.f32 %v559_v57, 0.0 }
 0x1c3   :  { %v562_v60 = vpop.f32.mrf.mxu1  ;;  %837 = vmatmul.mubr.bf16.gmra.mxu0 %v641_v55 }
 0x1c4   :  { %v563_v61 = vadd.f32 %v562_v60, %v1389_v9  ;;  %v619_v62 = vmax.f32 %v561_v58, 0.0 }
 0x1c5   :  { %v566_v63 = vpop.f32.mrf.mxu1 }
 0x1c6   :  { %v620_v1 = vmax.f32 %v563_v61, 0.0  ;;  %v643_v5 = vpack.c.bf16 %v619_v62, %v617_v2  ;;  %v567_v17 = vadd.f32 %v566_v63, %v1393_v10  ;;  %v1430_v63 = vld [vmem:[%s1460_s6] ss:$0 sm:$0xff]  ;;  %s1166_s6 = smov [#allocation5]  }
 0x1c7   :  { %v568_v3 = vpop.f32.mrf.mxu1  ;;  %s906_s12 = sshll.u32 %s1166_s6, 4  ;;  %s907_s12 = int_to_ptr.vmem [resolvable:$true] %s906_s12 }
 0x1c8   :  { %v644_v4 = vpack.c.bf16 %v620_v1, %v618_v0  ;;  %v569_v7 = vadd.f32 %v568_v3, %v1389_v9  ;;  %v621_v21 = vmax.f32 %v567_v17, 0.0  ;;  %s1138_s13 = scalar_lea.vmem %s907_s12, 2048  ;;  %p1143_p6 = scmp.lt.s32.totalorder %s907_s12, %s907_s12 }
 0x1c9   :  { %v570_v6 = vpop.f32.mrf.mxu1  ;;  %p1139_p5 = scmp.ne.s32.totalorder %s907_s12, %s1138_s13  ;;  %p1144_p7 = scmp.lt.s32.totalorder %s1138_s13, %s1138_s13 }
 0x1ca   :  { %v571_v18 = vadd.f32 %v570_v6, %v1393_v10  ;;  %844 = vmatprep.mubr.bf16.mxu0 %v644_v4  ;;  %v622_v19 = vmax.f32 %v569_v7, 0.0 }
 0x1cb   :  { %v572_v8 = vpop.f32.mrf.mxu1  ;;  %845 = vmatmul.mubr.bf16.gmra.mxu0 %v643_v5  ;;  %p1145_p8 = por %p1144_p7, %p1143_p6 }
 0x1cc   :  { %v573_v11 = vadd.f32 %v572_v8, %v1389_v9  ;;  %v623_v15 = vmax.f32 %v571_v18, 0.0 }
 0x1cd   :  { %v576_v16 = vpop.f32.mrf.mxu1  ;;  %p1146_p9 = pnand %p1145_p8, %p1139_p5 }
 0x1ce   :  { %v624_v20 = vmax.f32 %v573_v11, 0.0  ;;  %v645_v24 = vpack.c.bf16 %v623_v15, %v621_v21  ;;  %v577_v27 = vadd.f32 %v576_v16, %v1393_v10 }
 0x1cf   :  { %v578_v22 = vpop.f32.mrf.mxu1 }
 0x1d0   :  { %v646_v23 = vpack.c.bf16 %v624_v20, %v622_v19  ;;  %v579_v13 = vadd.f32 %v578_v22, %v1389_v9  ;;  %v625_v32 = vmax.f32 %v577_v27, 0.0 }
 0x1d1   :  { %v580_v25 = vpop.f32.mrf.mxu1 }
 0x1d2   :  { %v581_v26 = vadd.f32 %v580_v25, %v1393_v10  ;;  %852 = vmatprep.mubr.bf16.mxu0 %v646_v23  ;;  %v626_v30 = vmax.f32 %v579_v13, 0.0 }
 0x1d3   :  { %v582_v12 = vpop.f32.mrf.mxu1  ;;  %853 = vmatmul.mubr.bf16.gmra.mxu0 %v645_v24 }
 0x1d4   :  { %v583_v14 = vadd.f32 %v582_v12, %v1389_v9  ;;  %v627_v28 = vmax.f32 %v581_v26, 0.0 }
 0x1d5   :  { %v586_v29 = vpop.f32.mrf.mxu1 }
 0x1d6   :  { %v628_v31 = vmax.f32 %v583_v14, 0.0  ;;  %v647_v35 = vpack.c.bf16 %v627_v28, %v625_v32  ;;  %v587_v39 = vadd.f32 %v586_v29, %v1393_v10 }
 0x1d7   :  { %v588_v33 = vpop.f32.mrf.mxu1 }
 0x1d8   :  { %v648_v34 = vpack.c.bf16 %v628_v31, %v626_v30  ;;  %v589_v37 = vadd.f32 %v588_v33, %v1389_v9  ;;  %v629_v46 = vmax.f32 %v587_v39, 0.0 }
 0x1d9   :  { %v590_v36 = vpop.f32.mrf.mxu1 }
 0x1da   :  { %v591_v38 = vadd.f32 %v590_v36, %v1393_v10  ;;  %860 = vmatprep.mubr.bf16.mxu0 %v648_v34  ;;  %v630_v44 = vmax.f32 %v589_v37, 0.0 }
 0x1db   :  { %v592_v40 = vpop.f32.mrf.mxu1  ;;  %861 = vmatmul.mubr.bf16.gmra.mxu0 %v647_v35 }
 0x1dc   :  { %v593_v41 = vadd.f32 %v592_v40, %v1389_v9  ;;  %v631_v42 = vmax.f32 %v591_v38, 0.0 }
 0x1dd   :  { %v596_v43 = vpop.f32.mrf.mxu1 }
 0x1de   :  { %v632_v45 = vmax.f32 %v593_v41, 0.0  ;;  %v649_v49 = vpack.c.bf16 %v631_v42, %v629_v46  ;;  %v597_v53 = vadd.f32 %v596_v43, %v1393_v10 }
 0x1df   :  { %v598_v47 = vpop.f32.mrf.mxu1 }
 0x1e0   :  { %v650_v48 = vpack.c.bf16 %v632_v45, %v630_v44  ;;  %v599_v51 = vadd.f32 %v598_v47, %v1389_v9  ;;  %v633_v59 = vmax.f32 %v597_v53, 0.0 }
 0x1e1   :  { %v600_v50 = vpop.f32.mrf.mxu1 }
 0x1e2   :  { %v601_v52 = vadd.f32 %v600_v50, %v1393_v10  ;;  %868 = vmatprep.mubr.bf16.mxu0 %v650_v48  ;;  %v634_v57 = vmax.f32 %v599_v51, 0.0 }
 0x1e3   :  { %v602_v54 = vpop.f32.mrf.mxu1  ;;  %869 = vmatmul.mubr.bf16.gmra.mxu0 %v649_v49 }
 0x1e4   :  { %v603_v55 = vadd.f32 %v602_v54, %v1389_v9  ;;  %v635_v56 = vmax.f32 %v601_v52, 0.0 }
 0x1e6   :  { %v636_v58 = vmax.f32 %v603_v55, 0.0  ;;  %v651_v61 = vpack.c.bf16 %v635_v56, %v633_v59 }
 0x1e8   :  { %v652_v60 = vpack.c.bf16 %v636_v58, %v634_v57 }
 0x1ea   :  { %876 = vmatprep.mubr.bf16.mxu0 %v652_v60 }
 0x1eb   :  { %877 = vmatmul.mubr.bf16.gmra.mxu0 %v651_v61 }
 0x273   :  { %v995_v62 = vpop.f32.mrf.mxu0 }
 0x275   :  { %v996_v0 = vpop.f32.mrf.mxu0 }
 0x276   :  { %v997_v10 = vadd.f32 %v996_v0, %v995_v62 }
 0x277   :  { %v998_v1 = vpop.f32.mrf.mxu0 }
 0x278   :  { %v823_v2 = vadd.f32 %v997_v10, %v1430_v63 }
 0x279   :  { %v999_v9 = vpop.f32.mrf.mxu0 }
 0x27a   :  { %885 = vst [vmem:[#allocation5] sm:$0xff] %v823_v2  ;;  %v1000_v3 = vadd.f32 %v999_v9, %v998_v1 }
 0x27b   :  { %v1001_v4 = vpop.f32.mrf.mxu0 }
 0x27c   :  { %v826_v5 = vadd.f32 %v1000_v3, %v1430_v63 }
 0x27d   :  { %v1002_v6 = vpop.f32.mrf.mxu0 }
 0x27e   :  { %886 = vst [vmem:[#allocation5 + $0x8] sm:$0xff] %v826_v5  ;;  %v1003_v7 = vadd.f32 %v1002_v6, %v1001_v4 }
 0x27f   :  { %v1004_v18 = vpop.f32.mrf.mxu0 }
 0x280   :  { %v831_v17 = vadd.f32 %v1003_v7, %v1430_v63 }
 0x281   :  { %v1005_v8 = vpop.f32.mrf.mxu0 }
 0x282   :  { %887 = vst [vmem:[#allocation5 + $0x10] sm:$0xff] %v831_v17  ;;  %v1006_v11 = vadd.f32 %v1005_v8, %v1004_v18 }
 0x283   :  { %v1007_v15 = vpop.f32.mrf.mxu0 }
 0x284   :  { %v834_v16 = vadd.f32 %v1006_v11, %v1430_v63 }
 0x285   :  { %v1008_v19 = vpop.f32.mrf.mxu0 }
 0x286   :  { %888 = vst [vmem:[#allocation5 + $0x18] sm:$0xff] %v834_v16  ;;  %v1009_v20 = vadd.f32 %v1008_v19, %v1007_v15 }
 0x287   :  { %v1010_v21 = vpop.f32.mrf.mxu0 }
 0x288   :  { %v839_v22 = vadd.f32 %v1009_v20, %v1430_v63 }
 0x289   :  { %v1011_v23 = vpop.f32.mrf.mxu0 }
 0x28a   :  { %889 = vst [vmem:[#allocation5 + $0x20] sm:$0xff] %v839_v22  ;;  %v1012_v24 = vadd.f32 %v1011_v23, %v1010_v21 }
 0x28b   :  { %v1013_v25 = vpop.f32.mrf.mxu0 }
 0x28c   :  { %v842_v13 = vadd.f32 %v1012_v24, %v1430_v63 }
 0x28d   :  { %v1014_v26 = vpop.f32.mrf.mxu0 }
 0x28e   :  { %890 = vst [vmem:[#allocation5 + $0x28] sm:$0xff] %v842_v13  ;;  %v1015_v27 = vadd.f32 %v1014_v26, %v1013_v25 }
 0x28f   :  { %v1016_v12 = vpop.f32.mrf.mxu0 }
 0x290   :  { %v847_v14 = vadd.f32 %v1015_v27, %v1430_v63 }
 0x291   :  { %v1017_v28 = vpop.f32.mrf.mxu0 }
 0x292   :  { %891 = vst [vmem:[#allocation5 + $0x30] sm:$0xff] %v847_v14  ;;  %v1018_v29 = vadd.f32 %v1017_v28, %v1016_v12 }
 0x293   :  { %v1019_v30 = vpop.f32.mrf.mxu0 }
 0x294   :  { %v850_v31 = vadd.f32 %v1018_v29, %v1430_v63 }
 0x295   :  { %v1020_v32 = vpop.f32.mrf.mxu0 }
 0x296   :  { %892 = vst [vmem:[#allocation5 + $0x38] sm:$0xff] %v850_v31  ;;  %v1021_v33 = vadd.f32 %v1020_v32, %v1019_v30 }
 0x297   :  { %v1022_v34 = vpop.f32.mrf.mxu0 }
 0x298   :  { %v855_v35 = vadd.f32 %v1021_v33, %v1430_v63 }
 0x299   :  { %v1023_v36 = vpop.f32.mrf.mxu0 }
 0x29a   :  { %893 = vst [vmem:[#allocation5 + $0x40] sm:$0xff] %v855_v35  ;;  %v1024_v37 = vadd.f32 %v1023_v36, %v1022_v34 }
 0x29b   :  { %v1025_v38 = vpop.f32.mrf.mxu0 }
 0x29c   :  { %v858_v39 = vadd.f32 %v1024_v37, %v1430_v63 }
 0x29d   :  { %v1026_v40 = vpop.f32.mrf.mxu0 }
 0x29e   :  { %894 = vst [vmem:[#allocation5 + $0x48] sm:$0xff] %v858_v39  ;;  %v1027_v41 = vadd.f32 %v1026_v40, %v1025_v38 }
 0x29f   :  { %v1028_v42 = vpop.f32.mrf.mxu0 }
 0x2a0   :  { %v863_v43 = vadd.f32 %v1027_v41, %v1430_v63 }
 0x2a1   :  { %v1029_v44 = vpop.f32.mrf.mxu0 }
 0x2a2   :  { %895 = vst [vmem:[#allocation5 + $0x50] sm:$0xff] %v863_v43  ;;  %v1030_v45 = vadd.f32 %v1029_v44, %v1028_v42 }
 0x2a3   :  { %v1031_v46 = vpop.f32.mrf.mxu0 }
 0x2a4   :  { %v866_v47 = vadd.f32 %v1030_v45, %v1430_v63 }
 0x2a5   :  { %v1032_v48 = vpop.f32.mrf.mxu0 }
 0x2a6   :  { %896 = vst [vmem:[#allocation5 + $0x58] sm:$0xff] %v866_v47  ;;  %v1033_v49 = vadd.f32 %v1032_v48, %v1031_v46 }
 0x2a7   :  { %v1034_v50 = vpop.f32.mrf.mxu0 }
 0x2a8   :  { %v871_v51 = vadd.f32 %v1033_v49, %v1430_v63 }
 0x2a9   :  { %v1035_v52 = vpop.f32.mrf.mxu0 }
 0x2aa   :  { %897 = vst [vmem:[#allocation5 + $0x60] sm:$0xff] %v871_v51  ;;  %v1036_v53 = vadd.f32 %v1035_v52, %v1034_v50 }
 0x2ab   :  { %v1037_v54 = vpop.f32.mrf.mxu0 }
 0x2ac   :  { %v874_v55 = vadd.f32 %v1036_v53, %v1430_v63 }
 0x2ad   :  { %v1038_v56 = vpop.f32.mrf.mxu0 }
 0x2ae   :  { %898 = vst [vmem:[#allocation5 + $0x68] sm:$0xff] %v874_v55  ;;  %v1039_v57 = vadd.f32 %v1038_v56, %v1037_v54 }
 0x2af   :  { %v1040_v58 = vpop.f32.mrf.mxu0 }
 0x2b0   :  { %v879_v59 = vadd.f32 %v1039_v57, %v1430_v63 }
 0x2b1   :  { %v1041_v60 = vpop.f32.mrf.mxu0 }
 0x2b2   :  { %899 = vst [vmem:[#allocation5 + $0x70] sm:$0xff] %v879_v59  ;;  %v1042_v61 = vadd.f32 %v1041_v60, %v1040_v58 }
 0x2b4   :  { %v882_v62 = vadd.f32 %v1042_v61, %v1430_v63 }
 0x2b6   :  { %900 = vst [vmem:[#allocation5 + $0x78] sm:$0xff] %v882_v62 }
 0x2b7   :  { %1149 = shalt.err (!%p1146_p9)
}
 0x2b8   :  { %912 = dma.vmem_to_hbm [thread:$0]  %s907_s12, 2048, %s1461_s7, [#allocation4], %s1163_s27, %s1163_s27, %s1164_s28  }
 0x2b9   :  { %1160 = dma.done.wait [#allocation4], 2048  }
 0x2ba   :  { %1161 = vsyncadd [#allocation4], 4294965248 }
 0x2bb   :  { %916 = vsyncpa [#allocation3], 1 }
 0x2bc   :  { %917 = vsyncpa [#allocation4], 1 }

</bundles_post_ra>
